<compile_context>
chip_gen: v5e
topology: v5e:2x2
jax: 0.10.0
libtpu: 0.0.40
codegen_flags: <defaults>
</compile_context>

<pallas_src>
import functools

import jax
import jax.numpy as jnp
from jax import lax
from jax.experimental import pallas as pl
from jax.experimental.pallas import tpu as pltpu


def _lstm_block_kernel(gx_ref, whh_ref, out_ref, h_sc, c_sc, *, tt, hidden_size):
    """Run `tt` LSTM time steps per grid iteration; h/c carried in VMEM scratch."""
    H = hidden_size

    @pl.when(pl.program_id(0) == 0)
    def _():
        h_sc[...] = jnp.zeros_like(h_sc)
        c_sc[...] = jnp.zeros_like(c_sc)

    def step(i, carry):
        h = h_sc[...]                      # (B, H) f32
        c = c_sc[...]                      # (B, H) f32
        # Only the recurrent projection is on the serial critical path; the input
        # projection + bias were hoisted into `gx` (precomputed in the wrapper).
        gates = gx_ref[i] + jnp.dot(
            h.astype(jnp.bfloat16), whh_ref[...],
            preferred_element_type=jnp.float32)          # (B, 4H) f32

        # tanh-based sigmoid: one EUP op per gate instead of exp + reciprocal.
        i_g = 0.5 * jnp.tanh(0.5 * gates[:, 0:H]) + 0.5
        f_g = 0.5 * jnp.tanh(0.5 * gates[:, H:2 * H]) + 0.5
        g_g = jnp.tanh(gates[:, 2 * H:3 * H])
        o_g = 0.5 * jnp.tanh(0.5 * gates[:, 3 * H:4 * H]) + 0.5

        c_new = f_g * c + i_g * g_g
        h_new = o_g * jnp.tanh(c_new)

        c_sc[...] = c_new
        h_sc[...] = h_new
        out_ref[i] = h_new.astype(out_ref.dtype)
        return carry

    lax.fori_loop(0, tt, step, 0, unroll=True)


def _pick_time_block(T, max_tt=64):
    """Largest divisor of T that is <= max_tt (static at trace time)."""
    tt = min(T, max_tt)
    while T % tt:
        tt -= 1
    return tt


@functools.partial(jax.jit, static_argnames=("hidden_size",))
def lstm_forward_time_major(xs_tm, w_ih_t, w_hh_t_bf16, bias, *, hidden_size):
    """xs_tm: (T, B, D) f32 -> (T, B, H) f32."""
    T, B, D = xs_tm.shape
    H = hidden_size

    # Hoisted input projection: one big (T*B, D) x (D, 4H) matmul + fused bias,
    # done by XLA outside the sequential kernel.
    gx = (xs_tm.reshape(T * B, D) @ w_ih_t + bias).reshape(T, B, 4 * H)

    tt = _pick_time_block(T)
    kernel = functools.partial(_lstm_block_kernel, tt=tt, hidden_size=H)

    return pl.pallas_call(
        kernel,
        out_shape=jax.ShapeDtypeStruct((T, B, H), xs_tm.dtype),
        grid_spec=pltpu.PrefetchScalarGridSpec(
            num_scalar_prefetch=0,
            grid=(T // tt,),
            in_specs=[
                pl.BlockSpec((tt, B, 4 * H), lambda t: (t, 0, 0)),   # precomputed gates
                pl.BlockSpec((H, 4 * H), lambda t: (0, 0)),          # W_hh^T (bf16)
            ],
            out_specs=pl.BlockSpec((tt, B, H), lambda t: (t, 0, 0)),
            scratch_shapes=[
                pltpu.VMEM((B, H), jnp.float32),   # h carry
                pltpu.VMEM((B, H), jnp.float32),   # c carry
            ],
        ),
        compiler_params=pltpu.CompilerParams(
            dimension_semantics=("arbitrary",),   # time recurrence is sequential
        ),
    )(gx, w_hh_t_bf16)


class HandMadeLSTMPallas:
    """JAX/Pallas port of HandMadeLSTM (unidirectional, batch_first supported)."""
    # TODO(synk): bidirectional=True branch (second LSTMCell + reverse scan + concat)
    # is not implemented; the reference default (bidirectional=False) is covered.

    def __init__(self, input_size, hidden_size, batch_first, key):
        self.batch_first = batch_first
        self.hidden_size = hidden_size
        self.input_size = input_size
        k1, k2, k3, k4 = jax.random.split(key, 4)
        bound = 1.0 / (hidden_size ** 0.5)
        # Same parameterization as torch.nn.LSTMCell: W_ih (4H, D), W_hh (4H, H),
        # b_ih (4H,), b_hh (4H,); init U(-1/sqrt(H), 1/sqrt(H)).
        w_ih = jax.random.uniform(k1, (4 * hidden_size, input_size),
                                  jnp.float32, -bound, bound)
        w_hh = jax.random.uniform(k2, (4 * hidden_size, hidden_size),
                                  jnp.float32, -bound, bound)
        b_ih = jax.random.uniform(k3, (4 * hidden_size,), jnp.float32, -bound, bound)
        b_hh = jax.random.uniform(k4, (4 * hidden_size,), jnp.float32, -bound, bound)
        self.w_ih = w_ih
        self.w_hh = w_hh
        self.b_ih = b_ih
        self.b_hh = b_hh
        # Pre-transposed weights: W_ih^T stays f32 (used once in the hoisted XLA matmul),
        # W_hh^T is stored bf16 for the in-kernel recurrent MXU matmul.
        self.w_ih_t = jnp.transpose(w_ih)                                  # (D, 4H) f32
        self.w_hh_t_bf16 = jnp.transpose(w_hh).astype(jnp.bfloat16)        # (H, 4H) bf16
        self.bias = (b_ih + b_hh).reshape(1, 4 * hidden_size)              # (1, 4H) f32

    def __call__(self, xs):
        if self.batch_first:
            xs = jnp.transpose(xs, (1, 0, 2))  # (B, T, D) -> (T, B, D)
        rst = lstm_forward_time_major(
            xs, self.w_ih_t, self.w_hh_t_bf16, self.bias,
            hidden_size=self.hidden_size)     # (T, B, H)
        if self.batch_first:
            rst = jnp.transpose(rst, (1, 0, 2))  # -> (B, T, H)
        return rst, (None, None)


def _reference_forward(xs_tm, w_ih, w_hh, b_ih, b_hh, hidden_size):
    """Pure-JAX f32 reference matching torch.nn.LSTMCell semantics, time-major input."""
    T, B, _ = xs_tm.shape
    H = hidden_size
    h = jnp.zeros((B, H), jnp.float32)
    c = jnp.zeros((B, H), jnp.float32)
    outs = []
    for t in range(T):
        gates = xs_tm[t] @ w_ih.T + b_ih + h @ w_hh.T + b_hh
        i_g = jax.nn.sigmoid(gates[:, 0:H])
        f_g = jax.nn.sigmoid(gates[:, H:2 * H])
        g_g = jnp.tanh(gates[:, 2 * H:3 * H])
        o_g = jax.nn.sigmoid(gates[:, 3 * H:4 * H])
        c = f_g * c + i_g * g_g
        h = o_g * jnp.tanh(c)
        outs.append(h)
    return jnp.stack(outs, axis=0)


if __name__ == "__main__":
    key = jax.random.PRNGKey(0)
    k_param, k_x = jax.random.split(key)

    batch, seq, input_size, hidden_size = 2, 8, 16, 32

    model = HandMadeLSTMPallas(input_size=input_size, hidden_size=hidden_size,
                               batch_first=True, key=k_param)

    x = jax.random.normal(k_x, (batch, seq, input_size), dtype=jnp.float32)

    rst, (hn, cn) = model(x)
    rst = jax.block_until_ready(rst)
    assert rst.shape == (batch, seq, hidden_size)

    # Correctness check vs f32 pure-JAX LSTMCell reference. Tolerance is loosened
    # because the recurrent matmul uses bf16 operands (f32 accumulation/carries).
    ref_tm = _reference_forward(jnp.transpose(x, (1, 0, 2)),
                                model.w_ih, model.w_hh, model.b_ih, model.b_hh,
                                hidden_size)
    ref = jnp.transpose(ref_tm, (1, 0, 2))
    assert jnp.allclose(rst, ref, atol=2e-2, rtol=2e-2), "mismatch vs reference"

    print("KERNEL_OK")
</pallas_src>

<mosaic_0001>
module attributes {stable_mosaic.version = 11 : i64} {
  func.func @_lstm_block_kernel(%arg0: i32, %arg1: memref<8x2x128xf32, #tpu.memory_space<vmem>>, %arg2: memref<32x128xbf16, #tpu.memory_space<vmem>>, %arg3: memref<8x2x32xf32, #tpu.memory_space<vmem>>, %arg4: memref<2x32xf32, #tpu.memory_space<vmem>>, %arg5: memref<2x32xf32, #tpu.memory_space<vmem>>) attributes {dimension_semantics = [#tpu.dimension_semantics<arbitrary>], iteration_bounds = array<i64: 1>, scalar_prefetch = 0 : i64, scratch_operands = 2 : i64, tpu.core_type = #tpu.core_type<tc>, window_params = [{transform_indices = @transform_0, window_bounds = array<i64: 8, 2, 128>}, {pipeline_mode = #tpu.pipeline_mode<synchronous>, transform_indices = @transform_1, window_bounds = array<i64: 32, 128>}, {transform_indices = @transform_2, window_bounds = array<i64: 8, 2, 32>}]} {
    %c0_i32 = arith.constant 0 : i32
    %0 = arith.cmpi eq, %arg0, %c0_i32 : i32
    %1 = arith.extui %0 : i1 to i32
    %c0_i32_0 = arith.constant 0 : i32
    %2 = arith.cmpi ne, %1, %c0_i32_0 : i32
    scf.if %2 {
      %cst_192 = arith.constant 0.000000e+00 : f32
      %371 = vector.broadcast %cst_192 : f32 to vector<2x32xf32>
      %c0_193 = arith.constant 0 : index
      %c0_194 = arith.constant 0 : index
      %372 = vector.load %arg4[%c0_193, %c0_194] : memref<2x32xf32, #tpu.memory_space<vmem>>, vector<2x32xf32>
      tpu.vector_store %arg4[%c0_193, %c0_194], %371 {strides = array<i32>} : memref<2x32xf32, #tpu.memory_space<vmem>>, vector<2x32xf32>,
      %cst_195 = arith.constant 0.000000e+00 : f32
      %373 = vector.broadcast %cst_195 : f32 to vector<2x32xf32>
      %c0_196 = arith.constant 0 : index
      %c0_197 = arith.constant 0 : index
      %374 = vector.load %arg5[%c0_196, %c0_197] : memref<2x32xf32, #tpu.memory_space<vmem>>, vector<2x32xf32>
      tpu.vector_store %arg5[%c0_196, %c0_197], %373 {strides = array<i32>} : memref<2x32xf32, #tpu.memory_space<vmem>>, vector<2x32xf32>,
    } else {
    }
    %c0_i32_1 = arith.constant 0 : i32
    %c0 = arith.constant 0 : index
    %c0_2 = arith.constant 0 : index
    %3 = vector.load %arg4[%c0, %c0_2] : memref<2x32xf32, #tpu.memory_space<vmem>>, vector<2x32xf32>
    %c0_3 = arith.constant 0 : index
    %c0_4 = arith.constant 0 : index
    %4 = vector.load %arg5[%c0_3, %c0_4] : memref<2x32xf32, #tpu.memory_space<vmem>>, vector<2x32xf32>
    %5 = arith.index_cast %c0_i32_1 : i32 to index
    %c0_5 = arith.constant 0 : index
    %c0_6 = arith.constant 0 : index
    %6 = vector.load %arg1[%5, %c0_5, %c0_6] : memref<8x2x128xf32, #tpu.memory_space<vmem>>, vector<1x2x128xf32>
    %7 = vector.shape_cast %6 : vector<1x2x128xf32> to vector<2x128xf32>
    %8 = arith.truncf %3 : vector<2x32xf32> to vector<2x32xbf16>
    %c0_7 = arith.constant 0 : index
    %c0_8 = arith.constant 0 : index
    %9 = vector.load %arg2[%c0_7, %c0_8] : memref<32x128xbf16, #tpu.memory_space<vmem>>, vector<32x128xbf16>
    %cst = arith.constant dense<0.000000e+00> : vector<2x128xf32>
    %10 = tpu.matmul %8, %9, %cst {dimension_numbers = #tpu.dot_dimension_numbers<[1], [0], [0], [1], [0, 0, 1, 1], [], []>} : vector<2x32xbf16>, vector<32x128xbf16>, vector<2x128xf32> -> vector<2x128xf32>
    %11 = arith.addf %7, %10 : vector<2x128xf32>
    %12 = vector.extract_strided_slice %11 {offsets = [0, 0], sizes = [2, 32], strides = [1, 1]} : vector<2x128xf32> to vector<2x32xf32>
    %cst_9 = arith.constant 5.000000e-01 : f32
    %13 = vector.broadcast %cst_9 : f32 to vector<2x32xf32>
    %14 = arith.mulf %13, %12 : vector<2x32xf32>
    %15 = math.tanh %14 : vector<2x32xf32>
    %cst_10 = arith.constant 5.000000e-01 : f32
    %16 = vector.broadcast %cst_10 : f32 to vector<2x32xf32>
    %17 = arith.mulf %16, %15 : vector<2x32xf32>
    %cst_11 = arith.constant 5.000000e-01 : f32
    %18 = vector.broadcast %cst_11 : f32 to vector<2x32xf32>
    %19 = arith.addf %17, %18 : vector<2x32xf32>
    %20 = vector.extract_strided_slice %11 {offsets = [0, 32], sizes = [2, 32], strides = [1, 1]} : vector<2x128xf32> to vector<2x32xf32>
    %cst_12 = arith.constant 5.000000e-01 : f32
    %21 = vector.broadcast %cst_12 : f32 to vector<2x32xf32>
    %22 = arith.mulf %21, %20 : vector<2x32xf32>
    %23 = math.tanh %22 : vector<2x32xf32>
    %cst_13 = arith.constant 5.000000e-01 : f32
    %24 = vector.broadcast %cst_13 : f32 to vector<2x32xf32>
    %25 = arith.mulf %24, %23 : vector<2x32xf32>
    %cst_14 = arith.constant 5.000000e-01 : f32
    %26 = vector.broadcast %cst_14 : f32 to vector<2x32xf32>
    %27 = arith.addf %25, %26 : vector<2x32xf32>
    %28 = vector.extract_strided_slice %11 {offsets = [0, 64], sizes = [2, 32], strides = [1, 1]} : vector<2x128xf32> to vector<2x32xf32>
    %29 = math.tanh %28 : vector<2x32xf32>
    %30 = vector.extract_strided_slice %11 {offsets = [0, 96], sizes = [2, 32], strides = [1, 1]} : vector<2x128xf32> to vector<2x32xf32>
    %cst_15 = arith.constant 5.000000e-01 : f32
    %31 = vector.broadcast %cst_15 : f32 to vector<2x32xf32>
    %32 = arith.mulf %31, %30 : vector<2x32xf32>
    %33 = math.tanh %32 : vector<2x32xf32>
    %cst_16 = arith.constant 5.000000e-01 : f32
    %34 = vector.broadcast %cst_16 : f32 to vector<2x32xf32>
    %35 = arith.mulf %34, %33 : vector<2x32xf32>
    %cst_17 = arith.constant 5.000000e-01 : f32
    %36 = vector.broadcast %cst_17 : f32 to vector<2x32xf32>
    %37 = arith.addf %35, %36 : vector<2x32xf32>
    %38 = arith.mulf %27, %4 : vector<2x32xf32>
    %39 = arith.mulf %19, %29 : vector<2x32xf32>
    %40 = arith.addf %38, %39 : vector<2x32xf32>
    %41 = math.tanh %40 : vector<2x32xf32>
    %42 = arith.mulf %37, %41 : vector<2x32xf32>
    %c0_18 = arith.constant 0 : index
    %c0_19 = arith.constant 0 : index
    %43 = vector.load %arg5[%c0_18, %c0_19] : memref<2x32xf32, #tpu.memory_space<vmem>>, vector<2x32xf32>
    tpu.vector_store %arg5[%c0_18, %c0_19], %40 {strides = array<i32>} : memref<2x32xf32, #tpu.memory_space<vmem>>, vector<2x32xf32>,
    %c0_20 = arith.constant 0 : index
    %c0_21 = arith.constant 0 : index
    %44 = vector.load %arg4[%c0_20, %c0_21] : memref<2x32xf32, #tpu.memory_space<vmem>>, vector<2x32xf32>
    tpu.vector_store %arg4[%c0_20, %c0_21], %42 {strides = array<i32>} : memref<2x32xf32, #tpu.memory_space<vmem>>, vector<2x32xf32>,
    %45 = arith.index_cast %c0_i32_1 : i32 to index
    %c0_22 = arith.constant 0 : index
    %c0_23 = arith.constant 0 : index
    %46 = vector.load %arg3[%45, %c0_22, %c0_23] : memref<8x2x32xf32, #tpu.memory_space<vmem>>, vector<1x2x32xf32>
    %47 = vector.shape_cast %46 : vector<1x2x32xf32> to vector<2x32xf32>
    %48 = vector.shape_cast %42 : vector<2x32xf32> to vector<1x2x32xf32>
    tpu.vector_store %arg3[%45, %c0_22, %c0_23], %48 {strides = array<i32>} : memref<8x2x32xf32, #tpu.memory_space<vmem>>, vector<1x2x32xf32>,
    %c1_i32 = arith.constant 1 : i32
    %c0_24 = arith.constant 0 : index
    %c0_25 = arith.constant 0 : index
    %49 = vector.load %arg4[%c0_24, %c0_25] : memref<2x32xf32, #tpu.memory_space<vmem>>, vector<2x32xf32>
    %c0_26 = arith.constant 0 : index
    %c0_27 = arith.constant 0 : index
    %50 = vector.load %arg5[%c0_26, %c0_27] : memref<2x32xf32, #tpu.memory_space<vmem>>, vector<2x32xf32>
    %51 = arith.index_cast %c1_i32 : i32 to index
    %c0_28 = arith.constant 0 : index
    %c0_29 = arith.constant 0 : index
    %52 = vector.load %arg1[%51, %c0_28, %c0_29] : memref<8x2x128xf32, #tpu.memory_space<vmem>>, vector<1x2x128xf32>
    %53 = vector.shape_cast %52 : vector<1x2x128xf32> to vector<2x128xf32>
    %54 = arith.truncf %49 : vector<2x32xf32> to vector<2x32xbf16>
    %c0_30 = arith.constant 0 : index
    %c0_31 = arith.constant 0 : index
    %55 = vector.load %arg2[%c0_30, %c0_31] : memref<32x128xbf16, #tpu.memory_space<vmem>>, vector<32x128xbf16>
    %cst_32 = arith.constant dense<0.000000e+00> : vector<2x128xf32>
    %56 = tpu.matmul %54, %55, %cst_32 {dimension_numbers = #tpu.dot_dimension_numbers<[1], [0], [0], [1], [0, 0, 1, 1], [], []>} : vector<2x32xbf16>, vector<32x128xbf16>, vector<2x128xf32> -> vector<2x128xf32>
    %57 = arith.addf %53, %56 : vector<2x128xf32>
    %58 = vector.extract_strided_slice %57 {offsets = [0, 0], sizes = [2, 32], strides = [1, 1]} : vector<2x128xf32> to vector<2x32xf32>
    %cst_33 = arith.constant 5.000000e-01 : f32
    %59 = vector.broadcast %cst_33 : f32 to vector<2x32xf32>
    %60 = arith.mulf %59, %58 : vector<2x32xf32>
    %61 = math.tanh %60 : vector<2x32xf32>
    %cst_34 = arith.constant 5.000000e-01 : f32
    %62 = vector.broadcast %cst_34 : f32 to vector<2x32xf32>
    %63 = arith.mulf %62, %61 : vector<2x32xf32>
    %cst_35 = arith.constant 5.000000e-01 : f32
    %64 = vector.broadcast %cst_35 : f32 to vector<2x32xf32>
    %65 = arith.addf %63, %64 : vector<2x32xf32>
    %66 = vector.extract_strided_slice %57 {offsets = [0, 32], sizes = [2, 32], strides = [1, 1]} : vector<2x128xf32> to vector<2x32xf32>
    %cst_36 = arith.constant 5.000000e-01 : f32
    %67 = vector.broadcast %cst_36 : f32 to vector<2x32xf32>
    %68 = arith.mulf %67, %66 : vector<2x32xf32>
    %69 = math.tanh %68 : vector<2x32xf32>
    %cst_37 = arith.constant 5.000000e-01 : f32
    %70 = vector.broadcast %cst_37 : f32 to vector<2x32xf32>
    %71 = arith.mulf %70, %69 : vector<2x32xf32>
    %cst_38 = arith.constant 5.000000e-01 : f32
    %72 = vector.broadcast %cst_38 : f32 to vector<2x32xf32>
    %73 = arith.addf %71, %72 : vector<2x32xf32>
    %74 = vector.extract_strided_slice %57 {offsets = [0, 64], sizes = [2, 32], strides = [1, 1]} : vector<2x128xf32> to vector<2x32xf32>
    %75 = math.tanh %74 : vector<2x32xf32>
    %76 = vector.extract_strided_slice %57 {offsets = [0, 96], sizes = [2, 32], strides = [1, 1]} : vector<2x128xf32> to vector<2x32xf32>
    %cst_39 = arith.constant 5.000000e-01 : f32
    %77 = vector.broadcast %cst_39 : f32 to vector<2x32xf32>
    %78 = arith.mulf %77, %76 : vector<2x32xf32>
    %79 = math.tanh %78 : vector<2x32xf32>
    %cst_40 = arith.constant 5.000000e-01 : f32
    %80 = vector.broadcast %cst_40 : f32 to vector<2x32xf32>
    %81 = arith.mulf %80, %79 : vector<2x32xf32>
    %cst_41 = arith.constant 5.000000e-01 : f32
    %82 = vector.broadcast %cst_41 : f32 to vector<2x32xf32>
    %83 = arith.addf %81, %82 : vector<2x32xf32>
    %84 = arith.mulf %73, %50 : vector<2x32xf32>
    %85 = arith.mulf %65, %75 : vector<2x32xf32>
    %86 = arith.addf %84, %85 : vector<2x32xf32>
    %87 = math.tanh %86 : vector<2x32xf32>
    %88 = arith.mulf %83, %87 : vector<2x32xf32>
    %c0_42 = arith.constant 0 : index
    %c0_43 = arith.constant 0 : index
    %89 = vector.load %arg5[%c0_42, %c0_43] : memref<2x32xf32, #tpu.memory_space<vmem>>, vector<2x32xf32>
    tpu.vector_store %arg5[%c0_42, %c0_43], %86 {strides = array<i32>} : memref<2x32xf32, #tpu.memory_space<vmem>>, vector<2x32xf32>,
    %c0_44 = arith.constant 0 : index
    %c0_45 = arith.constant 0 : index
    %90 = vector.load %arg4[%c0_44, %c0_45] : memref<2x32xf32, #tpu.memory_space<vmem>>, vector<2x32xf32>
    tpu.vector_store %arg4[%c0_44, %c0_45], %88 {strides = array<i32>} : memref<2x32xf32, #tpu.memory_space<vmem>>, vector<2x32xf32>,
    %91 = arith.index_cast %c1_i32 : i32 to index
    %c0_46 = arith.constant 0 : index
    %c0_47 = arith.constant 0 : index
    %92 = vector.load %arg3[%91, %c0_46, %c0_47] : memref<8x2x32xf32, #tpu.memory_space<vmem>>, vector<1x2x32xf32>
    %93 = vector.shape_cast %92 : vector<1x2x32xf32> to vector<2x32xf32>
    %94 = vector.shape_cast %88 : vector<2x32xf32> to vector<1x2x32xf32>
    tpu.vector_store %arg3[%91, %c0_46, %c0_47], %94 {strides = array<i32>} : memref<8x2x32xf32, #tpu.memory_space<vmem>>, vector<1x2x32xf32>,
    %c2_i32 = arith.constant 2 : i32
    %c0_48 = arith.constant 0 : index
    %c0_49 = arith.constant 0 : index
    %95 = vector.load %arg4[%c0_48, %c0_49] : memref<2x32xf32, #tpu.memory_space<vmem>>, vector<2x32xf32>
    %c0_50 = arith.constant 0 : index
    %c0_51 = arith.constant 0 : index
    %96 = vector.load %arg5[%c0_50, %c0_51] : memref<2x32xf32, #tpu.memory_space<vmem>>, vector<2x32xf32>
    %97 = arith.index_cast %c2_i32 : i32 to index
    %c0_52 = arith.constant 0 : index
    %c0_53 = arith.constant 0 : index
    %98 = vector.load %arg1[%97, %c0_52, %c0_53] : memref<8x2x128xf32, #tpu.memory_space<vmem>>, vector<1x2x128xf32>
    %99 = vector.shape_cast %98 : vector<1x2x128xf32> to vector<2x128xf32>
    %100 = arith.truncf %95 : vector<2x32xf32> to vector<2x32xbf16>
    %c0_54 = arith.constant 0 : index
    %c0_55 = arith.constant 0 : index
    %101 = vector.load %arg2[%c0_54, %c0_55] : memref<32x128xbf16, #tpu.memory_space<vmem>>, vector<32x128xbf16>
    %cst_56 = arith.constant dense<0.000000e+00> : vector<2x128xf32>
    %102 = tpu.matmul %100, %101, %cst_56 {dimension_numbers = #tpu.dot_dimension_numbers<[1], [0], [0], [1], [0, 0, 1, 1], [], []>} : vector<2x32xbf16>, vector<32x128xbf16>, vector<2x128xf32> -> vector<2x128xf32>
    %103 = arith.addf %99, %102 : vector<2x128xf32>
    %104 = vector.extract_strided_slice %103 {offsets = [0, 0], sizes = [2, 32], strides = [1, 1]} : vector<2x128xf32> to vector<2x32xf32>
    %cst_57 = arith.constant 5.000000e-01 : f32
    %105 = vector.broadcast %cst_57 : f32 to vector<2x32xf32>
    %106 = arith.mulf %105, %104 : vector<2x32xf32>
    %107 = math.tanh %106 : vector<2x32xf32>
    %cst_58 = arith.constant 5.000000e-01 : f32
    %108 = vector.broadcast %cst_58 : f32 to vector<2x32xf32>
    %109 = arith.mulf %108, %107 : vector<2x32xf32>
    %cst_59 = arith.constant 5.000000e-01 : f32
    %110 = vector.broadcast %cst_59 : f32 to vector<2x32xf32>
    %111 = arith.addf %109, %110 : vector<2x32xf32>
    %112 = vector.extract_strided_slice %103 {offsets = [0, 32], sizes = [2, 32], strides = [1, 1]} : vector<2x128xf32> to vector<2x32xf32>
    %cst_60 = arith.constant 5.000000e-01 : f32
    %113 = vector.broadcast %cst_60 : f32 to vector<2x32xf32>
    %114 = arith.mulf %113, %112 : vector<2x32xf32>
    %115 = math.tanh %114 : vector<2x32xf32>
    %cst_61 = arith.constant 5.000000e-01 : f32
    %116 = vector.broadcast %cst_61 : f32 to vector<2x32xf32>
    %117 = arith.mulf %116, %115 : vector<2x32xf32>
    %cst_62 = arith.constant 5.000000e-01 : f32
    %118 = vector.broadcast %cst_62 : f32 to vector<2x32xf32>
    %119 = arith.addf %117, %118 : vector<2x32xf32>
    %120 = vector.extract_strided_slice %103 {offsets = [0, 64], sizes = [2, 32], strides = [1, 1]} : vector<2x128xf32> to vector<2x32xf32>
    %121 = math.tanh %120 : vector<2x32xf32>
    %122 = vector.extract_strided_slice %103 {offsets = [0, 96], sizes = [2, 32], strides = [1, 1]} : vector<2x128xf32> to vector<2x32xf32>
    %cst_63 = arith.constant 5.000000e-01 : f32
    %123 = vector.broadcast %cst_63 : f32 to vector<2x32xf32>
    %124 = arith.mulf %123, %122 : vector<2x32xf32>
    %125 = math.tanh %124 : vector<2x32xf32>
    %cst_64 = arith.constant 5.000000e-01 : f32
    %126 = vector.broadcast %cst_64 : f32 to vector<2x32xf32>
    %127 = arith.mulf %126, %125 : vector<2x32xf32>
    %cst_65 = arith.constant 5.000000e-01 : f32
    %128 = vector.broadcast %cst_65 : f32 to vector<2x32xf32>
    %129 = arith.addf %127, %128 : vector<2x32xf32>
    %130 = arith.mulf %119, %96 : vector<2x32xf32>
    %131 = arith.mulf %111, %121 : vector<2x32xf32>
    %132 = arith.addf %130, %131 : vector<2x32xf32>
    %133 = math.tanh %132 : vector<2x32xf32>
    %134 = arith.mulf %129, %133 : vector<2x32xf32>
    %c0_66 = arith.constant 0 : index
    %c0_67 = arith.constant 0 : index
    %135 = vector.load %arg5[%c0_66, %c0_67] : memref<2x32xf32, #tpu.memory_space<vmem>>, vector<2x32xf32>
    tpu.vector_store %arg5[%c0_66, %c0_67], %132 {strides = array<i32>} : memref<2x32xf32, #tpu.memory_space<vmem>>, vector<2x32xf32>,
    %c0_68 = arith.constant 0 : index
    %c0_69 = arith.constant 0 : index
    %136 = vector.load %arg4[%c0_68, %c0_69] : memref<2x32xf32, #tpu.memory_space<vmem>>, vector<2x32xf32>
    tpu.vector_store %arg4[%c0_68, %c0_69], %134 {strides = array<i32>} : memref<2x32xf32, #tpu.memory_space<vmem>>, vector<2x32xf32>,
    %137 = arith.index_cast %c2_i32 : i32 to index
    %c0_70 = arith.constant 0 : index
    %c0_71 = arith.constant 0 : index
    %138 = vector.load %arg3[%137, %c0_70, %c0_71] : memref<8x2x32xf32, #tpu.memory_space<vmem>>, vector<1x2x32xf32>
    %139 = vector.shape_cast %138 : vector<1x2x32xf32> to vector<2x32xf32>
    %140 = vector.shape_cast %134 : vector<2x32xf32> to vector<1x2x32xf32>
    tpu.vector_store %arg3[%137, %c0_70, %c0_71], %140 {strides = array<i32>} : memref<8x2x32xf32, #tpu.memory_space<vmem>>, vector<1x2x32xf32>,
    %c3_i32 = arith.constant 3 : i32
    %c0_72 = arith.constant 0 : index
    %c0_73 = arith.constant 0 : index
    %141 = vector.load %arg4[%c0_72, %c0_73] : memref<2x32xf32, #tpu.memory_space<vmem>>, vector<2x32xf32>
    %c0_74 = arith.constant 0 : index
    %c0_75 = arith.constant 0 : index
    %142 = vector.load %arg5[%c0_74, %c0_75] : memref<2x32xf32, #tpu.memory_space<vmem>>, vector<2x32xf32>
    %143 = arith.index_cast %c3_i32 : i32 to index
    %c0_76 = arith.constant 0 : index
    %c0_77 = arith.constant 0 : index
    %144 = vector.load %arg1[%143, %c0_76, %c0_77] : memref<8x2x128xf32, #tpu.memory_space<vmem>>, vector<1x2x128xf32>
    %145 = vector.shape_cast %144 : vector<1x2x128xf32> to vector<2x128xf32>
    %146 = arith.truncf %141 : vector<2x32xf32> to vector<2x32xbf16>
    %c0_78 = arith.constant 0 : index
    %c0_79 = arith.constant 0 : index
    %147 = vector.load %arg2[%c0_78, %c0_79] : memref<32x128xbf16, #tpu.memory_space<vmem>>, vector<32x128xbf16>
    %cst_80 = arith.constant dense<0.000000e+00> : vector<2x128xf32>
    %148 = tpu.matmul %146, %147, %cst_80 {dimension_numbers = #tpu.dot_dimension_numbers<[1], [0], [0], [1], [0, 0, 1, 1], [], []>} : vector<2x32xbf16>, vector<32x128xbf16>, vector<2x128xf32> -> vector<2x128xf32>
    %149 = arith.addf %145, %148 : vector<2x128xf32>
    %150 = vector.extract_strided_slice %149 {offsets = [0, 0], sizes = [2, 32], strides = [1, 1]} : vector<2x128xf32> to vector<2x32xf32>
    %cst_81 = arith.constant 5.000000e-01 : f32
    %151 = vector.broadcast %cst_81 : f32 to vector<2x32xf32>
    %152 = arith.mulf %151, %150 : vector<2x32xf32>
    %153 = math.tanh %152 : vector<2x32xf32>
    %cst_82 = arith.constant 5.000000e-01 : f32
    %154 = vector.broadcast %cst_82 : f32 to vector<2x32xf32>
    %155 = arith.mulf %154, %153 : vector<2x32xf32>
    %cst_83 = arith.constant 5.000000e-01 : f32
    %156 = vector.broadcast %cst_83 : f32 to vector<2x32xf32>
    %157 = arith.addf %155, %156 : vector<2x32xf32>
    %158 = vector.extract_strided_slice %149 {offsets = [0, 32], sizes = [2, 32], strides = [1, 1]} : vector<2x128xf32> to vector<2x32xf32>
    %cst_84 = arith.constant 5.000000e-01 : f32
    %159 = vector.broadcast %cst_84 : f32 to vector<2x32xf32>
    %160 = arith.mulf %159, %158 : vector<2x32xf32>
    %161 = math.tanh %160 : vector<2x32xf32>
    %cst_85 = arith.constant 5.000000e-01 : f32
    %162 = vector.broadcast %cst_85 : f32 to vector<2x32xf32>
    %163 = arith.mulf %162, %161 : vector<2x32xf32>
    %cst_86 = arith.constant 5.000000e-01 : f32
    %164 = vector.broadcast %cst_86 : f32 to vector<2x32xf32>
    %165 = arith.addf %163, %164 : vector<2x32xf32>
    %166 = vector.extract_strided_slice %149 {offsets = [0, 64], sizes = [2, 32], strides = [1, 1]} : vector<2x128xf32> to vector<2x32xf32>
    %167 = math.tanh %166 : vector<2x32xf32>
    %168 = vector.extract_strided_slice %149 {offsets = [0, 96], sizes = [2, 32], strides = [1, 1]} : vector<2x128xf32> to vector<2x32xf32>
    %cst_87 = arith.constant 5.000000e-01 : f32
    %169 = vector.broadcast %cst_87 : f32 to vector<2x32xf32>
    %170 = arith.mulf %169, %168 : vector<2x32xf32>
    %171 = math.tanh %170 : vector<2x32xf32>
    %cst_88 = arith.constant 5.000000e-01 : f32
    %172 = vector.broadcast %cst_88 : f32 to vector<2x32xf32>
    %173 = arith.mulf %172, %171 : vector<2x32xf32>
    %cst_89 = arith.constant 5.000000e-01 : f32
    %174 = vector.broadcast %cst_89 : f32 to vector<2x32xf32>
    %175 = arith.addf %173, %174 : vector<2x32xf32>
    %176 = arith.mulf %165, %142 : vector<2x32xf32>
    %177 = arith.mulf %157, %167 : vector<2x32xf32>
    %178 = arith.addf %176, %177 : vector<2x32xf32>
    %179 = math.tanh %178 : vector<2x32xf32>
    %180 = arith.mulf %175, %179 : vector<2x32xf32>
    %c0_90 = arith.constant 0 : index
    %c0_91 = arith.constant 0 : index
    %181 = vector.load %arg5[%c0_90, %c0_91] : memref<2x32xf32, #tpu.memory_space<vmem>>, vector<2x32xf32>
    tpu.vector_store %arg5[%c0_90, %c0_91], %178 {strides = array<i32>} : memref<2x32xf32, #tpu.memory_space<vmem>>, vector<2x32xf32>,
    %c0_92 = arith.constant 0 : index
    %c0_93 = arith.constant 0 : index
    %182 = vector.load %arg4[%c0_92, %c0_93] : memref<2x32xf32, #tpu.memory_space<vmem>>, vector<2x32xf32>
    tpu.vector_store %arg4[%c0_92, %c0_93], %180 {strides = array<i32>} : memref<2x32xf32, #tpu.memory_space<vmem>>, vector<2x32xf32>,
    %183 = arith.index_cast %c3_i32 : i32 to index
    %c0_94 = arith.constant 0 : index
    %c0_95 = arith.constant 0 : index
    %184 = vector.load %arg3[%183, %c0_94, %c0_95] : memref<8x2x32xf32, #tpu.memory_space<vmem>>, vector<1x2x32xf32>
    %185 = vector.shape_cast %184 : vector<1x2x32xf32> to vector<2x32xf32>
    %186 = vector.shape_cast %180 : vector<2x32xf32> to vector<1x2x32xf32>
    tpu.vector_store %arg3[%183, %c0_94, %c0_95], %186 {strides = array<i32>} : memref<8x2x32xf32, #tpu.memory_space<vmem>>, vector<1x2x32xf32>,
    %c4_i32 = arith.constant 4 : i32
    %c0_96 = arith.constant 0 : index
    %c0_97 = arith.constant 0 : index
    %187 = vector.load %arg4[%c0_96, %c0_97] : memref<2x32xf32, #tpu.memory_space<vmem>>, vector<2x32xf32>
    %c0_98 = arith.constant 0 : index
    %c0_99 = arith.constant 0 : index
    %188 = vector.load %arg5[%c0_98, %c0_99] : memref<2x32xf32, #tpu.memory_space<vmem>>, vector<2x32xf32>
    %189 = arith.index_cast %c4_i32 : i32 to index
    %c0_100 = arith.constant 0 : index
    %c0_101 = arith.constant 0 : index
    %190 = vector.load %arg1[%189, %c0_100, %c0_101] : memref<8x2x128xf32, #tpu.memory_space<vmem>>, vector<1x2x128xf32>
    %191 = vector.shape_cast %190 : vector<1x2x128xf32> to vector<2x128xf32>
    %192 = arith.truncf %187 : vector<2x32xf32> to vector<2x32xbf16>
    %c0_102 = arith.constant 0 : index
    %c0_103 = arith.constant 0 : index
    %193 = vector.load %arg2[%c0_102, %c0_103] : memref<32x128xbf16, #tpu.memory_space<vmem>>, vector<32x128xbf16>
    %cst_104 = arith.constant dense<0.000000e+00> : vector<2x128xf32>
    %194 = tpu.matmul %192, %193, %cst_104 {dimension_numbers = #tpu.dot_dimension_numbers<[1], [0], [0], [1], [0, 0, 1, 1], [], []>} : vector<2x32xbf16>, vector<32x128xbf16>, vector<2x128xf32> -> vector<2x128xf32>
    %195 = arith.addf %191, %194 : vector<2x128xf32>
    %196 = vector.extract_strided_slice %195 {offsets = [0, 0], sizes = [2, 32], strides = [1, 1]} : vector<2x128xf32> to vector<2x32xf32>
    %cst_105 = arith.constant 5.000000e-01 : f32
    %197 = vector.broadcast %cst_105 : f32 to vector<2x32xf32>
    %198 = arith.mulf %197, %196 : vector<2x32xf32>
    %199 = math.tanh %198 : vector<2x32xf32>
    %cst_106 = arith.constant 5.000000e-01 : f32
    %200 = vector.broadcast %cst_106 : f32 to vector<2x32xf32>
    %201 = arith.mulf %200, %199 : vector<2x32xf32>
    %cst_107 = arith.constant 5.000000e-01 : f32
    %202 = vector.broadcast %cst_107 : f32 to vector<2x32xf32>
    %203 = arith.addf %201, %202 : vector<2x32xf32>
    %204 = vector.extract_strided_slice %195 {offsets = [0, 32], sizes = [2, 32], strides = [1, 1]} : vector<2x128xf32> to vector<2x32xf32>
    %cst_108 = arith.constant 5.000000e-01 : f32
    %205 = vector.broadcast %cst_108 : f32 to vector<2x32xf32>
    %206 = arith.mulf %205, %204 : vector<2x32xf32>
    %207 = math.tanh %206 : vector<2x32xf32>
    %cst_109 = arith.constant 5.000000e-01 : f32
    %208 = vector.broadcast %cst_109 : f32 to vector<2x32xf32>
    %209 = arith.mulf %208, %207 : vector<2x32xf32>
    %cst_110 = arith.constant 5.000000e-01 : f32
    %210 = vector.broadcast %cst_110 : f32 to vector<2x32xf32>
    %211 = arith.addf %209, %210 : vector<2x32xf32>
    %212 = vector.extract_strided_slice %195 {offsets = [0, 64], sizes = [2, 32], strides = [1, 1]} : vector<2x128xf32> to vector<2x32xf32>
    %213 = math.tanh %212 : vector<2x32xf32>
    %214 = vector.extract_strided_slice %195 {offsets = [0, 96], sizes = [2, 32], strides = [1, 1]} : vector<2x128xf32> to vector<2x32xf32>
    %cst_111 = arith.constant 5.000000e-01 : f32
    %215 = vector.broadcast %cst_111 : f32 to vector<2x32xf32>
    %216 = arith.mulf %215, %214 : vector<2x32xf32>
    %217 = math.tanh %216 : vector<2x32xf32>
    %cst_112 = arith.constant 5.000000e-01 : f32
    %218 = vector.broadcast %cst_112 : f32 to vector<2x32xf32>
    %219 = arith.mulf %218, %217 : vector<2x32xf32>
    %cst_113 = arith.constant 5.000000e-01 : f32
    %220 = vector.broadcast %cst_113 : f32 to vector<2x32xf32>
    %221 = arith.addf %219, %220 : vector<2x32xf32>
    %222 = arith.mulf %211, %188 : vector<2x32xf32>
    %223 = arith.mulf %203, %213 : vector<2x32xf32>
    %224 = arith.addf %222, %223 : vector<2x32xf32>
    %225 = math.tanh %224 : vector<2x32xf32>
    %226 = arith.mulf %221, %225 : vector<2x32xf32>
    %c0_114 = arith.constant 0 : index
    %c0_115 = arith.constant 0 : index
    %227 = vector.load %arg5[%c0_114, %c0_115] : memref<2x32xf32, #tpu.memory_space<vmem>>, vector<2x32xf32>
    tpu.vector_store %arg5[%c0_114, %c0_115], %224 {strides = array<i32>} : memref<2x32xf32, #tpu.memory_space<vmem>>, vector<2x32xf32>,
    %c0_116 = arith.constant 0 : index
    %c0_117 = arith.constant 0 : index
    %228 = vector.load %arg4[%c0_116, %c0_117] : memref<2x32xf32, #tpu.memory_space<vmem>>, vector<2x32xf32>
    tpu.vector_store %arg4[%c0_116, %c0_117], %226 {strides = array<i32>} : memref<2x32xf32, #tpu.memory_space<vmem>>, vector<2x32xf32>,
    %229 = arith.index_cast %c4_i32 : i32 to index
    %c0_118 = arith.constant 0 : index
    %c0_119 = arith.constant 0 : index
    %230 = vector.load %arg3[%229, %c0_118, %c0_119] : memref<8x2x32xf32, #tpu.memory_space<vmem>>, vector<1x2x32xf32>
    %231 = vector.shape_cast %230 : vector<1x2x32xf32> to vector<2x32xf32>
    %232 = vector.shape_cast %226 : vector<2x32xf32> to vector<1x2x32xf32>
    tpu.vector_store %arg3[%229, %c0_118, %c0_119], %232 {strides = array<i32>} : memref<8x2x32xf32, #tpu.memory_space<vmem>>, vector<1x2x32xf32>,
    %c5_i32 = arith.constant 5 : i32
    %c0_120 = arith.constant 0 : index
    %c0_121 = arith.constant 0 : index
    %233 = vector.load %arg4[%c0_120, %c0_121] : memref<2x32xf32, #tpu.memory_space<vmem>>, vector<2x32xf32>
    %c0_122 = arith.constant 0 : index
    %c0_123 = arith.constant 0 : index
    %234 = vector.load %arg5[%c0_122, %c0_123] : memref<2x32xf32, #tpu.memory_space<vmem>>, vector<2x32xf32>
    %235 = arith.index_cast %c5_i32 : i32 to index
    %c0_124 = arith.constant 0 : index
    %c0_125 = arith.constant 0 : index
    %236 = vector.load %arg1[%235, %c0_124, %c0_125] : memref<8x2x128xf32, #tpu.memory_space<vmem>>, vector<1x2x128xf32>
    %237 = vector.shape_cast %236 : vector<1x2x128xf32> to vector<2x128xf32>
    %238 = arith.truncf %233 : vector<2x32xf32> to vector<2x32xbf16>
    %c0_126 = arith.constant 0 : index
    %c0_127 = arith.constant 0 : index
    %239 = vector.load %arg2[%c0_126, %c0_127] : memref<32x128xbf16, #tpu.memory_space<vmem>>, vector<32x128xbf16>
    %cst_128 = arith.constant dense<0.000000e+00> : vector<2x128xf32>
    %240 = tpu.matmul %238, %239, %cst_128 {dimension_numbers = #tpu.dot_dimension_numbers<[1], [0], [0], [1], [0, 0, 1, 1], [], []>} : vector<2x32xbf16>, vector<32x128xbf16>, vector<2x128xf32> -> vector<2x128xf32>
    %241 = arith.addf %237, %240 : vector<2x128xf32>
    %242 = vector.extract_strided_slice %241 {offsets = [0, 0], sizes = [2, 32], strides = [1, 1]} : vector<2x128xf32> to vector<2x32xf32>
    %cst_129 = arith.constant 5.000000e-01 : f32
    %243 = vector.broadcast %cst_129 : f32 to vector<2x32xf32>
    %244 = arith.mulf %243, %242 : vector<2x32xf32>
    %245 = math.tanh %244 : vector<2x32xf32>
    %cst_130 = arith.constant 5.000000e-01 : f32
    %246 = vector.broadcast %cst_130 : f32 to vector<2x32xf32>
    %247 = arith.mulf %246, %245 : vector<2x32xf32>
    %cst_131 = arith.constant 5.000000e-01 : f32
    %248 = vector.broadcast %cst_131 : f32 to vector<2x32xf32>
    %249 = arith.addf %247, %248 : vector<2x32xf32>
    %250 = vector.extract_strided_slice %241 {offsets = [0, 32], sizes = [2, 32], strides = [1, 1]} : vector<2x128xf32> to vector<2x32xf32>
    %cst_132 = arith.constant 5.000000e-01 : f32
    %251 = vector.broadcast %cst_132 : f32 to vector<2x32xf32>
    %252 = arith.mulf %251, %250 : vector<2x32xf32>
    %253 = math.tanh %252 : vector<2x32xf32>
    %cst_133 = arith.constant 5.000000e-01 : f32
    %254 = vector.broadcast %cst_133 : f32 to vector<2x32xf32>
    %255 = arith.mulf %254, %253 : vector<2x32xf32>
    %cst_134 = arith.constant 5.000000e-01 : f32
    %256 = vector.broadcast %cst_134 : f32 to vector<2x32xf32>
    %257 = arith.addf %255, %256 : vector<2x32xf32>
    %258 = vector.extract_strided_slice %241 {offsets = [0, 64], sizes = [2, 32], strides = [1, 1]} : vector<2x128xf32> to vector<2x32xf32>
    %259 = math.tanh %258 : vector<2x32xf32>
    %260 = vector.extract_strided_slice %241 {offsets = [0, 96], sizes = [2, 32], strides = [1, 1]} : vector<2x128xf32> to vector<2x32xf32>
    %cst_135 = arith.constant 5.000000e-01 : f32
    %261 = vector.broadcast %cst_135 : f32 to vector<2x32xf32>
    %262 = arith.mulf %261, %260 : vector<2x32xf32>
    %263 = math.tanh %262 : vector<2x32xf32>
    %cst_136 = arith.constant 5.000000e-01 : f32
    %264 = vector.broadcast %cst_136 : f32 to vector<2x32xf32>
    %265 = arith.mulf %264, %263 : vector<2x32xf32>
    %cst_137 = arith.constant 5.000000e-01 : f32
    %266 = vector.broadcast %cst_137 : f32 to vector<2x32xf32>
    %267 = arith.addf %265, %266 : vector<2x32xf32>
    %268 = arith.mulf %257, %234 : vector<2x32xf32>
    %269 = arith.mulf %249, %259 : vector<2x32xf32>
    %270 = arith.addf %268, %269 : vector<2x32xf32>
    %271 = math.tanh %270 : vector<2x32xf32>
    %272 = arith.mulf %267, %271 : vector<2x32xf32>
    %c0_138 = arith.constant 0 : index
    %c0_139 = arith.constant 0 : index
    %273 = vector.load %arg5[%c0_138, %c0_139] : memref<2x32xf32, #tpu.memory_space<vmem>>, vector<2x32xf32>
    tpu.vector_store %arg5[%c0_138, %c0_139], %270 {strides = array<i32>} : memref<2x32xf32, #tpu.memory_space<vmem>>, vector<2x32xf32>,
    %c0_140 = arith.constant 0 : index
    %c0_141 = arith.constant 0 : index
    %274 = vector.load %arg4[%c0_140, %c0_141] : memref<2x32xf32, #tpu.memory_space<vmem>>, vector<2x32xf32>
    tpu.vector_store %arg4[%c0_140, %c0_141], %272 {strides = array<i32>} : memref<2x32xf32, #tpu.memory_space<vmem>>, vector<2x32xf32>,
    %275 = arith.index_cast %c5_i32 : i32 to index
    %c0_142 = arith.constant 0 : index
    %c0_143 = arith.constant 0 : index
    %276 = vector.load %arg3[%275, %c0_142, %c0_143] : memref<8x2x32xf32, #tpu.memory_space<vmem>>, vector<1x2x32xf32>
    %277 = vector.shape_cast %276 : vector<1x2x32xf32> to vector<2x32xf32>
    %278 = vector.shape_cast %272 : vector<2x32xf32> to vector<1x2x32xf32>
    tpu.vector_store %arg3[%275, %c0_142, %c0_143], %278 {strides = array<i32>} : memref<8x2x32xf32, #tpu.memory_space<vmem>>, vector<1x2x32xf32>,
    %c6_i32 = arith.constant 6 : i32
    %c0_144 = arith.constant 0 : index
    %c0_145 = arith.constant 0 : index
    %279 = vector.load %arg4[%c0_144, %c0_145] : memref<2x32xf32, #tpu.memory_space<vmem>>, vector<2x32xf32>
    %c0_146 = arith.constant 0 : index
    %c0_147 = arith.constant 0 : index
    %280 = vector.load %arg5[%c0_146, %c0_147] : memref<2x32xf32, #tpu.memory_space<vmem>>, vector<2x32xf32>
    %281 = arith.index_cast %c6_i32 : i32 to index
    %c0_148 = arith.constant 0 : index
    %c0_149 = arith.constant 0 : index
    %282 = vector.load %arg1[%281, %c0_148, %c0_149] : memref<8x2x128xf32, #tpu.memory_space<vmem>>, vector<1x2x128xf32>
    %283 = vector.shape_cast %282 : vector<1x2x128xf32> to vector<2x128xf32>
    %284 = arith.truncf %279 : vector<2x32xf32> to vector<2x32xbf16>
    %c0_150 = arith.constant 0 : index
    %c0_151 = arith.constant 0 : index
    %285 = vector.load %arg2[%c0_150, %c0_151] : memref<32x128xbf16, #tpu.memory_space<vmem>>, vector<32x128xbf16>
    %cst_152 = arith.constant dense<0.000000e+00> : vector<2x128xf32>
    %286 = tpu.matmul %284, %285, %cst_152 {dimension_numbers = #tpu.dot_dimension_numbers<[1], [0], [0], [1], [0, 0, 1, 1], [], []>} : vector<2x32xbf16>, vector<32x128xbf16>, vector<2x128xf32> -> vector<2x128xf32>
    %287 = arith.addf %283, %286 : vector<2x128xf32>
    %288 = vector.extract_strided_slice %287 {offsets = [0, 0], sizes = [2, 32], strides = [1, 1]} : vector<2x128xf32> to vector<2x32xf32>
    %cst_153 = arith.constant 5.000000e-01 : f32
    %289 = vector.broadcast %cst_153 : f32 to vector<2x32xf32>
    %290 = arith.mulf %289, %288 : vector<2x32xf32>
    %291 = math.tanh %290 : vector<2x32xf32>
    %cst_154 = arith.constant 5.000000e-01 : f32
    %292 = vector.broadcast %cst_154 : f32 to vector<2x32xf32>
    %293 = arith.mulf %292, %291 : vector<2x32xf32>
    %cst_155 = arith.constant 5.000000e-01 : f32
    %294 = vector.broadcast %cst_155 : f32 to vector<2x32xf32>
    %295 = arith.addf %293, %294 : vector<2x32xf32>
    %296 = vector.extract_strided_slice %287 {offsets = [0, 32], sizes = [2, 32], strides = [1, 1]} : vector<2x128xf32> to vector<2x32xf32>
    %cst_156 = arith.constant 5.000000e-01 : f32
    %297 = vector.broadcast %cst_156 : f32 to vector<2x32xf32>
    %298 = arith.mulf %297, %296 : vector<2x32xf32>
    %299 = math.tanh %298 : vector<2x32xf32>
    %cst_157 = arith.constant 5.000000e-01 : f32
    %300 = vector.broadcast %cst_157 : f32 to vector<2x32xf32>
    %301 = arith.mulf %300, %299 : vector<2x32xf32>
    %cst_158 = arith.constant 5.000000e-01 : f32
    %302 = vector.broadcast %cst_158 : f32 to vector<2x32xf32>
    %303 = arith.addf %301, %302 : vector<2x32xf32>
    %304 = vector.extract_strided_slice %287 {offsets = [0, 64], sizes = [2, 32], strides = [1, 1]} : vector<2x128xf32> to vector<2x32xf32>
    %305 = math.tanh %304 : vector<2x32xf32>
    %306 = vector.extract_strided_slice %287 {offsets = [0, 96], sizes = [2, 32], strides = [1, 1]} : vector<2x128xf32> to vector<2x32xf32>
    %cst_159 = arith.constant 5.000000e-01 : f32
    %307 = vector.broadcast %cst_159 : f32 to vector<2x32xf32>
    %308 = arith.mulf %307, %306 : vector<2x32xf32>
    %309 = math.tanh %308 : vector<2x32xf32>
    %cst_160 = arith.constant 5.000000e-01 : f32
    %310 = vector.broadcast %cst_160 : f32 to vector<2x32xf32>
    %311 = arith.mulf %310, %309 : vector<2x32xf32>
    %cst_161 = arith.constant 5.000000e-01 : f32
    %312 = vector.broadcast %cst_161 : f32 to vector<2x32xf32>
    %313 = arith.addf %311, %312 : vector<2x32xf32>
    %314 = arith.mulf %303, %280 : vector<2x32xf32>
    %315 = arith.mulf %295, %305 : vector<2x32xf32>
    %316 = arith.addf %314, %315 : vector<2x32xf32>
    %317 = math.tanh %316 : vector<2x32xf32>
    %318 = arith.mulf %313, %317 : vector<2x32xf32>
    %c0_162 = arith.constant 0 : index
    %c0_163 = arith.constant 0 : index
    %319 = vector.load %arg5[%c0_162, %c0_163] : memref<2x32xf32, #tpu.memory_space<vmem>>, vector<2x32xf32>
    tpu.vector_store %arg5[%c0_162, %c0_163], %316 {strides = array<i32>} : memref<2x32xf32, #tpu.memory_space<vmem>>, vector<2x32xf32>,
    %c0_164 = arith.constant 0 : index
    %c0_165 = arith.constant 0 : index
    %320 = vector.load %arg4[%c0_164, %c0_165] : memref<2x32xf32, #tpu.memory_space<vmem>>, vector<2x32xf32>
    tpu.vector_store %arg4[%c0_164, %c0_165], %318 {strides = array<i32>} : memref<2x32xf32, #tpu.memory_space<vmem>>, vector<2x32xf32>,
    %321 = arith.index_cast %c6_i32 : i32 to index
    %c0_166 = arith.constant 0 : index
    %c0_167 = arith.constant 0 : index
    %322 = vector.load %arg3[%321, %c0_166, %c0_167] : memref<8x2x32xf32, #tpu.memory_space<vmem>>, vector<1x2x32xf32>
    %323 = vector.shape_cast %322 : vector<1x2x32xf32> to vector<2x32xf32>
    %324 = vector.shape_cast %318 : vector<2x32xf32> to vector<1x2x32xf32>
    tpu.vector_store %arg3[%321, %c0_166, %c0_167], %324 {strides = array<i32>} : memref<8x2x32xf32, #tpu.memory_space<vmem>>, vector<1x2x32xf32>,
    %c7_i32 = arith.constant 7 : i32
    %c0_168 = arith.constant 0 : index
    %c0_169 = arith.constant 0 : index
    %325 = vector.load %arg4[%c0_168, %c0_169] : memref<2x32xf32, #tpu.memory_space<vmem>>, vector<2x32xf32>
    %c0_170 = arith.constant 0 : index
    %c0_171 = arith.constant 0 : index
    %326 = vector.load %arg5[%c0_170, %c0_171] : memref<2x32xf32, #tpu.memory_space<vmem>>, vector<2x32xf32>
    %327 = arith.index_cast %c7_i32 : i32 to index
    %c0_172 = arith.constant 0 : index
    %c0_173 = arith.constant 0 : index
    %328 = vector.load %arg1[%327, %c0_172, %c0_173] : memref<8x2x128xf32, #tpu.memory_space<vmem>>, vector<1x2x128xf32>
    %329 = vector.shape_cast %328 : vector<1x2x128xf32> to vector<2x128xf32>
    %330 = arith.truncf %325 : vector<2x32xf32> to vector<2x32xbf16>
    %c0_174 = arith.constant 0 : index
    %c0_175 = arith.constant 0 : index
    %331 = vector.load %arg2[%c0_174, %c0_175] : memref<32x128xbf16, #tpu.memory_space<vmem>>, vector<32x128xbf16>
    %cst_176 = arith.constant dense<0.000000e+00> : vector<2x128xf32>
    %332 = tpu.matmul %330, %331, %cst_176 {dimension_numbers = #tpu.dot_dimension_numbers<[1], [0], [0], [1], [0, 0, 1, 1], [], []>} : vector<2x32xbf16>, vector<32x128xbf16>, vector<2x128xf32> -> vector<2x128xf32>
    %333 = arith.addf %329, %332 : vector<2x128xf32>
    %334 = vector.extract_strided_slice %333 {offsets = [0, 0], sizes = [2, 32], strides = [1, 1]} : vector<2x128xf32> to vector<2x32xf32>
    %cst_177 = arith.constant 5.000000e-01 : f32
    %335 = vector.broadcast %cst_177 : f32 to vector<2x32xf32>
    %336 = arith.mulf %335, %334 : vector<2x32xf32>
    %337 = math.tanh %336 : vector<2x32xf32>
    %cst_178 = arith.constant 5.000000e-01 : f32
    %338 = vector.broadcast %cst_178 : f32 to vector<2x32xf32>
    %339 = arith.mulf %338, %337 : vector<2x32xf32>
    %cst_179 = arith.constant 5.000000e-01 : f32
    %340 = vector.broadcast %cst_179 : f32 to vector<2x32xf32>
    %341 = arith.addf %339, %340 : vector<2x32xf32>
    %342 = vector.extract_strided_slice %333 {offsets = [0, 32], sizes = [2, 32], strides = [1, 1]} : vector<2x128xf32> to vector<2x32xf32>
    %cst_180 = arith.constant 5.000000e-01 : f32
    %343 = vector.broadcast %cst_180 : f32 to vector<2x32xf32>
    %344 = arith.mulf %343, %342 : vector<2x32xf32>
    %345 = math.tanh %344 : vector<2x32xf32>
    %cst_181 = arith.constant 5.000000e-01 : f32
    %346 = vector.broadcast %cst_181 : f32 to vector<2x32xf32>
    %347 = arith.mulf %346, %345 : vector<2x32xf32>
    %cst_182 = arith.constant 5.000000e-01 : f32
    %348 = vector.broadcast %cst_182 : f32 to vector<2x32xf32>
    %349 = arith.addf %347, %348 : vector<2x32xf32>
    %350 = vector.extract_strided_slice %333 {offsets = [0, 64], sizes = [2, 32], strides = [1, 1]} : vector<2x128xf32> to vector<2x32xf32>
    %351 = math.tanh %350 : vector<2x32xf32>
    %352 = vector.extract_strided_slice %333 {offsets = [0, 96], sizes = [2, 32], strides = [1, 1]} : vector<2x128xf32> to vector<2x32xf32>
    %cst_183 = arith.constant 5.000000e-01 : f32
    %353 = vector.broadcast %cst_183 : f32 to vector<2x32xf32>
    %354 = arith.mulf %353, %352 : vector<2x32xf32>
    %355 = math.tanh %354 : vector<2x32xf32>
    %cst_184 = arith.constant 5.000000e-01 : f32
    %356 = vector.broadcast %cst_184 : f32 to vector<2x32xf32>
    %357 = arith.mulf %356, %355 : vector<2x32xf32>
    %cst_185 = arith.constant 5.000000e-01 : f32
    %358 = vector.broadcast %cst_185 : f32 to vector<2x32xf32>
    %359 = arith.addf %357, %358 : vector<2x32xf32>
    %360 = arith.mulf %349, %326 : vector<2x32xf32>
    %361 = arith.mulf %341, %351 : vector<2x32xf32>
    %362 = arith.addf %360, %361 : vector<2x32xf32>
    %363 = math.tanh %362 : vector<2x32xf32>
    %364 = arith.mulf %359, %363 : vector<2x32xf32>
    %c0_186 = arith.constant 0 : index
    %c0_187 = arith.constant 0 : index
    %365 = vector.load %arg5[%c0_186, %c0_187] : memref<2x32xf32, #tpu.memory_space<vmem>>, vector<2x32xf32>
    tpu.vector_store %arg5[%c0_186, %c0_187], %362 {strides = array<i32>} : memref<2x32xf32, #tpu.memory_space<vmem>>, vector<2x32xf32>,
    %c0_188 = arith.constant 0 : index
    %c0_189 = arith.constant 0 : index
    %366 = vector.load %arg4[%c0_188, %c0_189] : memref<2x32xf32, #tpu.memory_space<vmem>>, vector<2x32xf32>
    tpu.vector_store %arg4[%c0_188, %c0_189], %364 {strides = array<i32>} : memref<2x32xf32, #tpu.memory_space<vmem>>, vector<2x32xf32>,
    %367 = arith.index_cast %c7_i32 : i32 to index
    %c0_190 = arith.constant 0 : index
    %c0_191 = arith.constant 0 : index
    %368 = vector.load %arg3[%367, %c0_190, %c0_191] : memref<8x2x32xf32, #tpu.memory_space<vmem>>, vector<1x2x32xf32>
    %369 = vector.shape_cast %368 : vector<1x2x32xf32> to vector<2x32xf32>
    %370 = vector.shape_cast %364 : vector<2x32xf32> to vector<1x2x32xf32>
    tpu.vector_store %arg3[%367, %c0_190, %c0_191], %370 {strides = array<i32>} : memref<8x2x32xf32, #tpu.memory_space<vmem>>, vector<1x2x32xf32>,
    %c8_i32 = arith.constant 8 : i32
    return
  }
  func.func @transform_0(%arg0: i32) -> (i32, i32, i32) {
    %c0_i32 = arith.constant 0 : i32
    %c0_i32_0 = arith.constant 0 : i32
    %c0_i32_1 = arith.constant 0 : i32
    return %arg0, %c0_i32, %c0_i32_0 : i32, i32, i32
  }
  func.func @transform_1(%arg0: i32) -> (i32, i32) {
    %c0_i32 = arith.constant 0 : i32
    %c0_i32_0 = arith.constant 0 : i32
    %c0_i32_1 = arith.constant 0 : i32
    return %c0_i32, %c0_i32_0 : i32, i32
  }
  func.func @transform_2(%arg0: i32) -> (i32, i32, i32) {
    %c0_i32 = arith.constant 0 : i32
    %c0_i32_0 = arith.constant 0 : i32
    %c0_i32_1 = arith.constant 0 : i32
    return %arg0, %c0_i32, %c0_i32_0 : i32, i32, i32
  }
}

</mosaic_0001>

<bundles_post_ra>
// kernel: lstm_forward_time_major.1
= control target key start
LH: loop header
LB: loop body
LE: loop exit
PB: predicated region body
PF: predicated region fallthrough
CT: control target
= control target key end

     0   :  { %vm17_vm0 = vcmask 254976   ;;  %v821_v1 = vmov 0.0   ;;  %s1001_s0 = inlined_call_operand.vmem [shape: f32[8,2,128], index: 0, kind: input, shape index: {}]   ;;  %s1002_s1 = inlined_call_operand.vmem [shape: bf16[32,128], index: 1, kind: input, shape index: {}]   ;;  %s1003_s2 = inlined_call_operand.hbm [shape: f32[8,2,32], index: 2, kind: output, shape index: {}]  }
   0x1   :  { %v726_v0 = vld [vmem:[%s1002_s1 + $0x8] sm:$0xff]  ;;  %18 = vst.msk [vmem:[#allocation2] sm:$0x3] %vm17_vm0, %v821_v1 }
   0x2   :  { %7 = vsyncpa [#allocation5], 0  ;;  %50 = vmatpush.bf16.msra.mxu0 %v726_v0  ;;  %v725_v2 = vld [vmem:[%s1002_s1] sm:$0xff]  ;;  %19 = vst.msk [vmem:[#allocation3] sm:$0x3] %vm17_vm0, %v821_v1  ;;  %vm40_vm1 = vcmask 261120  }
   0x3   :  { %v22_v5 = vld [vmem:[%s1001_s0] sm:$0x3]  ;;  %s822_s15 = smov 64   ;;  %s823_s16 = smov 32   ;;  %v728_v24 = vld [vmem:[%s1002_s1 + $0x8] sm:$0xff] }
   0x4   :  { %s824_s17 = smov 96   ;;  %126 = vmatpush.bf16.msra.mxu1 %v728_v24  ;;  %v727_v25 = vld [vmem:[%s1002_s1] sm:$0xff]  ;;  %v730_v51 = vld [vmem:[%s1002_s1 + $0x8] sm:$0xff]  ;;  %s634_s9 = sshll.u32 %s1003_s2, 4  ;;  %s635_s9 = int_to_ptr.hbm [resolvable:$true] %s634_s9 }
   0x5   :  { %v655_v31 = vld [vmem:[%s1001_s0 + $0x2] sm:$0x3]  ;;  %202 = vmatpush.bf16.msra.mxu2 %v730_v51  ;;  %v665_v56 = vld [vmem:[%s1001_s0 + $0x4] sm:$0x3] }
   0x6   :  { %51 = vmatpush.bf16.msra.mxu0 %v725_v2  ;;  %v729_v52 = vld [vmem:[%s1002_s1] sm:$0xff] }
   0x8   :  { %v20_v3 = vld [vmem:[#allocation2] sm:$0x3]  ;;  %127 = vmatpush.bf16.msra.mxu1 %v727_v25 }
   0x9   :  { %v23_v4 = vpack.c.bf16 %v20_v3, %v20_v3  ;;  %v21_v10 = vld [vmem:[#allocation3] sm:$0x3]  ;;  %203 = vmatpush.bf16.msra.mxu2 %v729_v52 }
   0xb   :  { %654 = vmatmul.msk.bf16.vlgmr.msra.gmra.mxu0 %vm40_vm1, %v23_v4 }
  0x88   :  { %v53_v6 = vpop.f32.mrf.mxu0 }
  0x89   :  { %v57_v7 = vadd.f32 %v53_v6, %v22_v5 }
  0x8b   :  { %747 = vtanh.f32 %v57_v7  ;;  %v58_v11 = vmul.f32 0.5, %v57_v7 }
  0x8d   :  { %749 = vtanh.f32 %v58_v11 }
  0x90   :  { %v55_v8 = vpop.f32.mrf.mxu0 }
  0x91   :  { %v748_v9 = vpop.eup %747 }
  0x92   :  { %69 = vrot.lane.b32.xlu0 %v748_v9, %s822_s15 }
  0x93   :  { %v750_v12 = vpop.eup %749 }
  0x94   :  { %v60_v13 = vmul.f32 0.5, %v750_v12  ;;  %v732_v12 = vld [vmem:[%s1002_s1 + $0x8] sm:$0xff] }
  0x95   :  { %278 = vmatpush.bf16.msra.mxu3 %v732_v12 }
  0x96   :  { %v61_v14 = vadd.f32 0.5, %v60_v13  ;;  %v731_v13 = vld [vmem:[%s1002_s1] sm:$0xff] }
  0x99   :  { %279 = vmatpush.bf16.msra.mxu3 %v731_v13 }
  0x9a   :  { %64 = vrot.lane.b32.xlu0 %v21_v10, %s823_s16 }
 0x104   :  { %v70_v15 = vpop.permute.xlu0 %69 }
 0x105   :  { %v72_v16 = vmul.f32 %v70_v15, %v61_v14 }
 0x107   :  { %74 = vrot.lane.b32.xlu1 %v72_v16, %s823_s16 }
 0x10c   :  { %v65_v17 = vpop.permute.xlu0 %64 }
 0x10d   :  { %v67_v18 = vmul.f32 %v65_v17, %v61_v14  ;;  %v675_v17 = vld [vmem:[%s1001_s0 + $0x6] sm:$0x3] }
 0x179   :  { %v75_v19 = vpop.permute.xlu1 %74 }
 0x17a   :  { %v77_v20 = vadd.f32 %v75_v19, %v67_v18 }
 0x17c   :  { %751 = vtanh.f32 %v77_v20 }
 0x182   :  { %v752_v21 = vpop.eup %751 }
 0x183   :  { %80 = vrot.lane.b32.xlu1 %v752_v21, %s822_s15 }
 0x1f5   :  { %v81_v22 = vpop.permute.xlu1 %80 }
 0x1f6   :  { %v83_v23 = vmul.f32 %v81_v22, %v61_v14 }
 0x1f8   :  { %91 = vrot.lane.b32.xlu2 %v83_v23, %s823_s16 }
 0x200   :  { %85 = vrot.lane.b32.xlu2 %v77_v20, %s824_s17 }
 0x252   :  { %v92_v26 = vpop.permute.xlu2 %91 }
 0x253   :  { %94 = vst.msk [vmem:[#allocation2] sm:$0x3] %vm17_vm0, %v92_v26 }
 0x254   :  { %95 = vst.msk [vmem:[#allocation4] sm:$0x3] %vm17_vm0, %v92_v26 }
 0x25a   :  { %v86_v27 = vpop.permute.xlu2 %85  ;;  %v96_v28 = vld [vmem:[#allocation2] sm:$0x3] }
 0x25b   :  { %89 = vst.msk [vmem:[#allocation3] sm:$0x3] %vm17_vm0, %v86_v27  ;;  %v100_v29 = vpack.c.bf16 %v96_v28, %v96_v28 }
 0x25d   :  { %664 = vmatmul.msk.bf16.vlgmr.msra.gmra.mxu1 %vm40_vm1, %v100_v29 }
 0x262   :  { %v97_v30 = vld [vmem:[#allocation3] sm:$0x3] }
 0x263   :  { %140 = vrot.lane.b32.xlu1 %v97_v30, %s823_s16 }
 0x2d5   :  { %v141_v42 = vpop.permute.xlu1 %140 }
 0x2da   :  { %v129_v32 = vpop.f32.mrf.mxu1 }
 0x2db   :  { %v133_v33 = vadd.f32 %v655_v31, %v129_v32 }
 0x2dd   :  { %753 = vtanh.f32 %v133_v33  ;;  %v134_v36 = vmul.f32 0.5, %v133_v33 }
 0x2df   :  { %755 = vtanh.f32 %v134_v36 }
 0x2e2   :  { %v131_v34 = vpop.f32.mrf.mxu1 }
 0x2e3   :  { %v754_v35 = vpop.eup %753  ;;  %v734_v34 = vld [vmem:[%s1002_s1 + $0x8] sm:$0xff] }
 0x2e4   :  { %145 = vrot.lane.b32.xlu0 %v754_v35, %s822_s15  ;;  %354 = vmatpush.bf16.msrb.mxu0 %v734_v34 }
 0x2e5   :  { %v756_v37 = vpop.eup %755 }
 0x2e6   :  { %v136_v38 = vmul.f32 0.5, %v756_v37 }
 0x2e8   :  { %v137_v39 = vadd.f32 0.5, %v136_v38  ;;  %v733_v38 = vld [vmem:[%s1002_s1] sm:$0xff] }
 0x2e9   :  { %355 = vmatpush.bf16.msrb.mxu0 %v733_v38 }
 0x2ea   :  { %v143_v43 = vmul.f32 %v141_v42, %v137_v39  ;;  %v685_v42 = vld [vmem:[%s1001_s0 + $0x8] sm:$0x3] }
 0x356   :  { %v146_v40 = vpop.permute.xlu0 %145 }
 0x357   :  { %v148_v41 = vmul.f32 %v146_v40, %v137_v39 }
 0x359   :  { %150 = vrot.lane.b32.xlu2 %v148_v41, %s823_s16 }
 0x3b3   :  { %v151_v44 = vpop.permute.xlu2 %150 }
 0x3b4   :  { %v153_v45 = vadd.f32 %v151_v44, %v143_v43 }
 0x3b6   :  { %757 = vtanh.f32 %v153_v45  ;;  %161 = vrot.lane.b32.xlu2 %v153_v45, %s824_s17 }
 0x3bc   :  { %v758_v46 = vpop.eup %757 }
 0x3bd   :  { %156 = vrot.lane.b32.xlu0 %v758_v46, %s822_s15 }
 0x410   :  { %v162_v47 = vpop.permute.xlu2 %161 }
 0x411   :  { %164 = vst.msk [vmem:[#allocation3] sm:$0x3] %vm17_vm0, %v162_v47 }
 0x418   :  { %v173_v50 = vld [vmem:[#allocation3] sm:$0x3] }
 0x42f   :  { %v157_v48 = vpop.permute.xlu0 %156 }
 0x430   :  { %v159_v49 = vmul.f32 %v157_v48, %v137_v39 }
 0x432   :  { %166 = vrot.lane.b32.xlu1 %v159_v49, %s823_s16 }
 0x43a   :  { %216 = vrot.lane.b32.xlu1 %v173_v50, %s823_s16 }
 0x4a4   :  { %v167_v53 = vpop.permute.xlu1 %166 }
 0x4a5   :  { %169 = vst.msk [vmem:[#allocation2] sm:$0x3] %vm17_vm0, %v167_v53 }
 0x4a6   :  { %171 = vst.msk [vmem:[#allocation4 + $0x2] sm:$0x3] %vm17_vm0, %v167_v53 }
 0x4ac   :  { %v172_v54 = vld [vmem:[#allocation2] sm:$0x3]  ;;  %v217_v3 = vpop.permute.xlu1 %216 }
 0x4ad   :  { %v176_v55 = vpack.c.bf16 %v172_v54, %v172_v54 }
 0x4af   :  { %674 = vmatmul.msk.bf16.vlgmr.msra.gmra.mxu2 %vm40_vm1, %v176_v55 }
 0x532   :  { %v205_v57 = vpop.f32.mrf.mxu2 }
 0x533   :  { %v209_v58 = vadd.f32 %v665_v56, %v205_v57 }
 0x535   :  { %759 = vtanh.f32 %v209_v58  ;;  %v210_v61 = vmul.f32 0.5, %v209_v58 }
 0x537   :  { %761 = vtanh.f32 %v210_v61 }
 0x53a   :  { %v207_v59 = vpop.f32.mrf.mxu2 }
 0x53b   :  { %v760_v60 = vpop.eup %759  ;;  %v736_v59 = vld [vmem:[%s1002_s1 + $0x8] sm:$0xff] }
 0x53c   :  { %221 = vrot.lane.b32.xlu0 %v760_v60, %s822_s15  ;;  %430 = vmatpush.bf16.msrb.mxu1 %v736_v59 }
 0x53d   :  { %v762_v62 = vpop.eup %761 }
 0x53e   :  { %v212_v63 = vmul.f32 0.5, %v762_v62 }
 0x540   :  { %v213_v0 = vadd.f32 0.5, %v212_v63  ;;  %v735_v63 = vld [vmem:[%s1002_s1] sm:$0xff] }
 0x541   :  { %431 = vmatpush.bf16.msrb.mxu1 %v735_v63 }
 0x542   :  { %v219_v4 = vmul.f32 %v217_v3, %v213_v0  ;;  %v695_v3 = vld [vmem:[%s1001_s0 + $0xa] sm:$0x3] }
 0x5ae   :  { %v222_v1 = vpop.permute.xlu0 %221 }
 0x5af   :  { %v224_v2 = vmul.f32 %v222_v1, %v213_v0 }
 0x5b1   :  { %226 = vrot.lane.b32.xlu2 %v224_v2, %s823_s16 }
 0x60b   :  { %v227_v5 = vpop.permute.xlu2 %226 }
 0x60c   :  { %v229_v6 = vadd.f32 %v227_v5, %v219_v4 }
 0x60e   :  { %763 = vtanh.f32 %v229_v6  ;;  %237 = vrot.lane.b32.xlu2 %v229_v6, %s824_s17 }
 0x614   :  { %v764_v7 = vpop.eup %763 }
 0x615   :  { %232 = vrot.lane.b32.xlu0 %v764_v7, %s822_s15 }
 0x668   :  { %v238_v8 = vpop.permute.xlu2 %237 }
 0x669   :  { %240 = vst.msk [vmem:[#allocation3] sm:$0x3] %vm17_vm0, %v238_v8 }
 0x670   :  { %v249_v11 = vld [vmem:[#allocation3] sm:$0x3] }
 0x687   :  { %v233_v9 = vpop.permute.xlu0 %232 }
 0x688   :  { %v235_v10 = vmul.f32 %v233_v9, %v213_v0 }
 0x68a   :  { %242 = vrot.lane.b32.xlu1 %v235_v10, %s823_s16 }
 0x692   :  { %292 = vrot.lane.b32.xlu1 %v249_v11, %s823_s16 }
 0x6fc   :  { %v243_v14 = vpop.permute.xlu1 %242 }
 0x6fd   :  { %245 = vst.msk [vmem:[#allocation2] sm:$0x3] %vm17_vm0, %v243_v14 }
 0x6fe   :  { %247 = vst.msk [vmem:[#allocation4 + $0x4] sm:$0x3] %vm17_vm0, %v243_v14 }
 0x704   :  { %v248_v15 = vld [vmem:[#allocation2] sm:$0x3]  ;;  %v293_v28 = vpop.permute.xlu1 %292 }
 0x705   :  { %v252_v16 = vpack.c.bf16 %v248_v15, %v248_v15 }
 0x707   :  { %684 = vmatmul.msk.bf16.vlgmr.msra.gmra.mxu3 %vm40_vm1, %v252_v16 }
 0x78a   :  { %v281_v18 = vpop.f32.mrf.mxu3 }
 0x78b   :  { %v285_v19 = vadd.f32 %v675_v17, %v281_v18 }
 0x78d   :  { %765 = vtanh.f32 %v285_v19  ;;  %v286_v22 = vmul.f32 0.5, %v285_v19 }
 0x78f   :  { %767 = vtanh.f32 %v286_v22 }
 0x792   :  { %v283_v20 = vpop.f32.mrf.mxu3 }
 0x793   :  { %v766_v21 = vpop.eup %765  ;;  %v738_v20 = vld [vmem:[%s1002_s1 + $0x8] sm:$0xff] }
 0x794   :  { %297 = vrot.lane.b32.xlu0 %v766_v21, %s822_s15  ;;  %506 = vmatpush.bf16.msrb.mxu2 %v738_v20 }
 0x795   :  { %v768_v23 = vpop.eup %767 }
 0x796   :  { %v288_v24 = vmul.f32 0.5, %v768_v23 }
 0x798   :  { %v289_v25 = vadd.f32 0.5, %v288_v24  ;;  %v737_v24 = vld [vmem:[%s1002_s1] sm:$0xff] }
 0x799   :  { %507 = vmatpush.bf16.msrb.mxu2 %v737_v24 }
 0x79a   :  { %v295_v29 = vmul.f32 %v293_v28, %v289_v25  ;;  %v705_v28 = vld [vmem:[%s1001_s0 + $0xc] sm:$0x3] }
 0x806   :  { %v298_v26 = vpop.permute.xlu0 %297 }
 0x807   :  { %v300_v27 = vmul.f32 %v298_v26, %v289_v25 }
 0x809   :  { %302 = vrot.lane.b32.xlu2 %v300_v27, %s823_s16 }
 0x863   :  { %v303_v30 = vpop.permute.xlu2 %302 }
 0x864   :  { %v305_v31 = vadd.f32 %v303_v30, %v295_v29 }
 0x866   :  { %769 = vtanh.f32 %v305_v31  ;;  %313 = vrot.lane.b32.xlu2 %v305_v31, %s824_s17 }
 0x86c   :  { %v770_v32 = vpop.eup %769 }
 0x86d   :  { %308 = vrot.lane.b32.xlu0 %v770_v32, %s822_s15 }
 0x8c0   :  { %v314_v33 = vpop.permute.xlu2 %313 }
 0x8c1   :  { %316 = vst.msk [vmem:[#allocation3] sm:$0x3] %vm17_vm0, %v314_v33 }
 0x8c8   :  { %v325_v37 = vld [vmem:[#allocation3] sm:$0x3] }
 0x8df   :  { %v309_v35 = vpop.permute.xlu0 %308 }
 0x8e0   :  { %v311_v36 = vmul.f32 %v309_v35, %v289_v25 }
 0x8e2   :  { %318 = vrot.lane.b32.xlu1 %v311_v36, %s823_s16 }
 0x8ea   :  { %368 = vrot.lane.b32.xlu1 %v325_v37, %s823_s16 }
 0x954   :  { %v319_v39 = vpop.permute.xlu1 %318 }
 0x955   :  { %321 = vst.msk [vmem:[#allocation2] sm:$0x3] %vm17_vm0, %v319_v39 }
 0x956   :  { %323 = vst.msk [vmem:[#allocation4 + $0x6] sm:$0x3] %vm17_vm0, %v319_v39 }
 0x95c   :  { %v324_v40 = vld [vmem:[#allocation2] sm:$0x3]  ;;  %v369_v53 = vpop.permute.xlu1 %368 }
 0x95d   :  { %v328_v41 = vpack.c.bf16 %v324_v40, %v324_v40 }
 0x95f   :  { %694 = vmatmul.msk.bf16.vlgmr.msrb.gmra.mxu0 %vm40_vm1, %v328_v41 }
 0x9dc   :  { %v357_v43 = vpop.f32.mrf.mxu0 }
 0x9dd   :  { %v361_v44 = vadd.f32 %v685_v42, %v357_v43 }
 0x9df   :  { %771 = vtanh.f32 %v361_v44  ;;  %v362_v47 = vmul.f32 0.5, %v361_v44 }
 0x9e1   :  { %773 = vtanh.f32 %v362_v47 }
 0x9e4   :  { %v359_v45 = vpop.f32.mrf.mxu0 }
 0x9e5   :  { %v772_v46 = vpop.eup %771  ;;  %v740_v45 = vld [vmem:[%s1002_s1 + $0x8] sm:$0xff] }
 0x9e6   :  { %373 = vrot.lane.b32.xlu0 %v772_v46, %s822_s15  ;;  %582 = vmatpush.bf16.msrb.mxu3 %v740_v45 }
 0x9e7   :  { %v774_v48 = vpop.eup %773 }
 0x9e8   :  { %v364_v49 = vmul.f32 0.5, %v774_v48 }
 0x9ea   :  { %v365_v50 = vadd.f32 0.5, %v364_v49  ;;  %v739_v49 = vld [vmem:[%s1002_s1] sm:$0xff] }
 0x9eb   :  { %583 = vmatpush.bf16.msrb.mxu3 %v739_v49 }
 0x9ec   :  { %v371_v54 = vmul.f32 %v369_v53, %v365_v50  ;;  %v715_v53 = vld [vmem:[%s1001_s0 + $0xe] sm:$0x3]  ;;  %s825_s0 = smov [#allocation4]  }
 0x9ed   :  { %s632_s1 = sshll.u32 %s825_s0, 4  ;;  %s633_s1 = int_to_ptr.vmem [resolvable:$true] %s632_s1 }
 0xa58   :  { %v374_v51 = vpop.permute.xlu0 %373 }
 0xa59   :  { %v376_v52 = vmul.f32 %v374_v51, %v365_v50 }
 0xa5b   :  { %378 = vrot.lane.b32.xlu2 %v376_v52, %s823_s16 }
 0xab5   :  { %v379_v55 = vpop.permute.xlu2 %378 }
 0xab6   :  { %v381_v56 = vadd.f32 %v379_v55, %v371_v54 }
 0xab8   :  { %775 = vtanh.f32 %v381_v56  ;;  %389 = vrot.lane.b32.xlu2 %v381_v56, %s824_s17 }
 0xabe   :  { %v776_v57 = vpop.eup %775 }
 0xabf   :  { %384 = vrot.lane.b32.xlu0 %v776_v57, %s822_s15 }
 0xb12   :  { %v390_v58 = vpop.permute.xlu2 %389 }
 0xb13   :  { %392 = vst.msk [vmem:[#allocation3] sm:$0x3] %vm17_vm0, %v390_v58 }
 0xb1a   :  { %v401_v62 = vld [vmem:[#allocation3] sm:$0x3] }
 0xb31   :  { %v385_v60 = vpop.permute.xlu0 %384 }
 0xb32   :  { %v387_v61 = vmul.f32 %v385_v60, %v365_v50 }
 0xb34   :  { %394 = vrot.lane.b32.xlu1 %v387_v61, %s823_s16 }
 0xb3c   :  { %444 = vrot.lane.b32.xlu1 %v401_v62, %s823_s16 }
 0xba6   :  { %v395_v0 = vpop.permute.xlu1 %394 }
 0xba7   :  { %397 = vst.msk [vmem:[#allocation2] sm:$0x3] %vm17_vm0, %v395_v0 }
 0xba8   :  { %399 = vst.msk [vmem:[#allocation4 + $0x8] sm:$0x3] %vm17_vm0, %v395_v0 }
 0xbae   :  { %v400_v1 = vld [vmem:[#allocation2] sm:$0x3]  ;;  %v445_v14 = vpop.permute.xlu1 %444 }
 0xbaf   :  { %v404_v2 = vpack.c.bf16 %v400_v1, %v400_v1 }
 0xbb1   :  { %704 = vmatmul.msk.bf16.vlgmr.msrb.gmra.mxu1 %vm40_vm1, %v404_v2 }
 0xc2e   :  { %v433_v4 = vpop.f32.mrf.mxu1 }
 0xc2f   :  { %v437_v5 = vadd.f32 %v695_v3, %v433_v4 }
 0xc31   :  { %777 = vtanh.f32 %v437_v5  ;;  %v438_v8 = vmul.f32 0.5, %v437_v5 }
 0xc33   :  { %779 = vtanh.f32 %v438_v8 }
 0xc36   :  { %v435_v6 = vpop.f32.mrf.mxu1 }
 0xc37   :  { %v778_v7 = vpop.eup %777 }
 0xc38   :  { %449 = vrot.lane.b32.xlu0 %v778_v7, %s822_s15 }
 0xc39   :  { %v780_v9 = vpop.eup %779 }
 0xc3a   :  { %v440_v10 = vmul.f32 0.5, %v780_v9 }
 0xc3c   :  { %v441_v11 = vadd.f32 0.5, %v440_v10 }
 0xc3e   :  { %v447_v15 = vmul.f32 %v445_v14, %v441_v11 }
 0xcaa   :  { %v450_v12 = vpop.permute.xlu0 %449 }
 0xcab   :  { %v452_v13 = vmul.f32 %v450_v12, %v441_v11 }
 0xcad   :  { %454 = vrot.lane.b32.xlu2 %v452_v13, %s823_s16 }
 0xd07   :  { %v455_v16 = vpop.permute.xlu2 %454 }
 0xd08   :  { %v457_v17 = vadd.f32 %v455_v16, %v447_v15 }
 0xd0a   :  { %781 = vtanh.f32 %v457_v17  ;;  %465 = vrot.lane.b32.xlu2 %v457_v17, %s824_s17 }
 0xd10   :  { %v782_v18 = vpop.eup %781 }
 0xd11   :  { %460 = vrot.lane.b32.xlu0 %v782_v18, %s822_s15 }
 0xd64   :  { %v466_v19 = vpop.permute.xlu2 %465 }
 0xd65   :  { %468 = vst.msk [vmem:[#allocation3] sm:$0x3] %vm17_vm0, %v466_v19 }
 0xd6c   :  { %v477_v23 = vld [vmem:[#allocation3] sm:$0x3] }
 0xd83   :  { %v461_v21 = vpop.permute.xlu0 %460 }
 0xd84   :  { %v463_v22 = vmul.f32 %v461_v21, %v441_v11 }
 0xd86   :  { %470 = vrot.lane.b32.xlu1 %v463_v22, %s823_s16 }
 0xd8e   :  { %520 = vrot.lane.b32.xlu1 %v477_v23, %s823_s16 }
 0xdf8   :  { %v471_v25 = vpop.permute.xlu1 %470 }
 0xdf9   :  { %473 = vst.msk [vmem:[#allocation2] sm:$0x3] %vm17_vm0, %v471_v25 }
 0xdfa   :  { %475 = vst.msk [vmem:[#allocation4 + $0xa] sm:$0x3] %vm17_vm0, %v471_v25 }
 0xe00   :  { %v476_v26 = vld [vmem:[#allocation2] sm:$0x3]  ;;  %v521_v39 = vpop.permute.xlu1 %520 }
 0xe01   :  { %v480_v27 = vpack.c.bf16 %v476_v26, %v476_v26 }
 0xe03   :  { %714 = vmatmul.msk.bf16.vlgmr.msrb.gmra.mxu2 %vm40_vm1, %v480_v27 }
 0xe86   :  { %v509_v29 = vpop.f32.mrf.mxu2 }
 0xe87   :  { %v513_v30 = vadd.f32 %v705_v28, %v509_v29 }
 0xe89   :  { %783 = vtanh.f32 %v513_v30  ;;  %v514_v33 = vmul.f32 0.5, %v513_v30 }
 0xe8b   :  { %785 = vtanh.f32 %v514_v33 }
 0xe8e   :  { %v511_v31 = vpop.f32.mrf.mxu2 }
 0xe8f   :  { %v784_v32 = vpop.eup %783 }
 0xe90   :  { %525 = vrot.lane.b32.xlu0 %v784_v32, %s822_s15 }
 0xe91   :  { %v786_v34 = vpop.eup %785 }
 0xe92   :  { %v516_v35 = vmul.f32 0.5, %v786_v34 }
 0xe94   :  { %v517_v36 = vadd.f32 0.5, %v516_v35 }
 0xe96   :  { %v523_v40 = vmul.f32 %v521_v39, %v517_v36 }
 0xf02   :  { %v526_v37 = vpop.permute.xlu0 %525 }
 0xf03   :  { %v528_v38 = vmul.f32 %v526_v37, %v517_v36 }
 0xf05   :  { %530 = vrot.lane.b32.xlu2 %v528_v38, %s823_s16 }
 0xf5f   :  { %v531_v41 = vpop.permute.xlu2 %530 }
 0xf60   :  { %v533_v42 = vadd.f32 %v531_v41, %v523_v40 }
 0xf62   :  { %787 = vtanh.f32 %v533_v42  ;;  %541 = vrot.lane.b32.xlu2 %v533_v42, %s824_s17 }
 0xf68   :  { %v788_v43 = vpop.eup %787 }
 0xf69   :  { %536 = vrot.lane.b32.xlu0 %v788_v43, %s822_s15 }
 0xfbc   :  { %v542_v44 = vpop.permute.xlu2 %541 }
 0xfbd   :  { %544 = vst.msk [vmem:[#allocation3] sm:$0x3] %vm17_vm0, %v542_v44 }
 0xfc4   :  { %v553_v48 = vld [vmem:[#allocation3] sm:$0x3] }
 0xfdb   :  { %v537_v46 = vpop.permute.xlu0 %536 }
 0xfdc   :  { %v539_v47 = vmul.f32 %v537_v46, %v517_v36 }
 0xfde   :  { %546 = vrot.lane.b32.xlu1 %v539_v47, %s823_s16 }
 0xfe6   :  { %596 = vrot.lane.b32.xlu1 %v553_v48, %s823_s16 }
0x1050   :  { %v547_v50 = vpop.permute.xlu1 %546 }
0x1051   :  { %549 = vst.msk [vmem:[#allocation2] sm:$0x3] %vm17_vm0, %v547_v50 }
0x1052   :  { %551 = vst.msk [vmem:[#allocation4 + $0xc] sm:$0x3] %vm17_vm0, %v547_v50 }
0x1058   :  { %v552_v51 = vld [vmem:[#allocation2] sm:$0x3]  ;;  %v597_v0 = vpop.permute.xlu1 %596 }
0x1059   :  { %v556_v52 = vpack.c.bf16 %v552_v51, %v552_v51 }
0x105b   :  { %724 = vmatmul.msk.bf16.vlgmr.msrb.gmra.mxu3 %vm40_vm1, %v556_v52 }
0x10de   :  { %v585_v54 = vpop.f32.mrf.mxu3 }
0x10df   :  { %v589_v55 = vadd.f32 %v715_v53, %v585_v54 }
0x10e1   :  { %789 = vtanh.f32 %v589_v55  ;;  %v590_v58 = vmul.f32 0.5, %v589_v55 }
0x10e3   :  { %791 = vtanh.f32 %v590_v58 }
0x10e6   :  { %v587_v56 = vpop.f32.mrf.mxu3 }
0x10e7   :  { %v790_v57 = vpop.eup %789 }
0x10e8   :  { %601 = vrot.lane.b32.xlu0 %v790_v57, %s822_s15 }
0x10e9   :  { %v792_v59 = vpop.eup %791 }
0x10ea   :  { %v592_v60 = vmul.f32 0.5, %v792_v59 }
0x10ec   :  { %v593_v61 = vadd.f32 0.5, %v592_v60 }
0x10ee   :  { %v599_v1 = vmul.f32 %v597_v0, %v593_v61 }
0x115a   :  { %v602_v62 = vpop.permute.xlu0 %601 }
0x115b   :  { %v604_v63 = vmul.f32 %v602_v62, %v593_v61 }
0x115d   :  { %606 = vrot.lane.b32.xlu2 %v604_v63, %s823_s16 }
0x11b7   :  { %v607_v2 = vpop.permute.xlu2 %606 }
0x11b8   :  { %v609_v3 = vadd.f32 %v607_v2, %v599_v1 }
0x11ba   :  { %793 = vtanh.f32 %v609_v3  ;;  %617 = vrot.lane.b32.xlu2 %v609_v3, %s824_s17 }
0x11c0   :  { %v794_v4 = vpop.eup %793 }
0x11c1   :  { %612 = vrot.lane.b32.xlu0 %v794_v4, %s822_s15  ;;  %s826_s15 = smov 2  }
0x1214   :  { %v618_v5 = vpop.permute.xlu2 %617 }
0x1215   :  { %620 = vst.msk [vmem:[#allocation3] sm:$0x3] %vm17_vm0, %v618_v5 }
0x1233   :  { %v613_v6 = vpop.permute.xlu0 %612 }
0x1234   :  { %v615_v7 = vmul.f32 %v613_v6, %v593_v61 }
0x1236   :  { %622 = vrot.lane.b32.xlu1 %v615_v7, %s823_s16 }
0x12a8   :  { %v623_v8 = vpop.permute.xlu1 %622 }
0x12a9   :  { %625 = vst.msk [vmem:[#allocation2] sm:$0x3] %vm17_vm0, %v623_v8 }
0x12aa   :  { %627 = vst.msk [vmem:[#allocation4 + $0xe] sm:$0x3] %vm17_vm0, %v623_v8 }
0x12ab   :  { %640 = dma.vmem_to_hbm [thread:$0]  %s633_s1, 256, %s635_s9, [#allocation5], %s823_s16, %s823_s16, %s826_s15  }
0x12ac   :  { %819 = dma.done.wait [#allocation5], 256  }
0x12ad   :  { %820 = vsyncadd [#allocation5], 4294967040 }
0x12ae   :  { %645 = vsyncpa [#allocation5], 1 }

</bundles_post_ra>
